<compile_context>
chip_gen: v5e
topology: v5e:2x2
jax: 0.10.0
libtpu: 0.0.40
codegen_flags: <defaults>
</compile_context>

<pallas_src>
import jax
import jax.numpy as jnp
from jax.experimental import pallas as pl
from jax.experimental.pallas import tpu as pltpu


def _conv1x1_kernel(x_ref, w_ref, b_ref, o_ref):
    # x_ref: (Nb, Cin, thw), w_ref: (Cout, Cin), b_ref: (Cout, 1), o_ref: (Nb, Cout, thw)
    w = w_ref[...]
    b = b_ref[...]
    # Static (small, capped) unroll over the images packed into this grid step.
    for i in range(x_ref.shape[0]):
        acc = jnp.dot(w, x_ref[i], preferred_element_type=jnp.float32)
        o_ref[i] = (acc + b).astype(o_ref.dtype)


def _choose_tiling(N, Cin, Cout, HW, *, thw_cap=8192, per_block_budget=4 << 20,
                   nb_cap=8):
    """Pick (images-per-step, spatial-tile).

    thw: full HW when it fits under the cap (legal full-extent block), else a
         lane-dense multiple of 128 (8192) with a cdiv grid (ragged tail masked).
    nb:  pack several images per step for small feature maps so per-step overhead
         and DMA descriptor setup are amortized; capped by a VMEM budget and an
         unroll cap.
    Keep >= 2 total grid steps so megacore / dual-TC chips get parallel work.
    """
    thw = HW if HW <= thw_cap else thw_cap          # thw_cap is a multiple of 128
    hw_steps = pl.cdiv(HW, thw)

    per_image_bytes = (Cin + Cout) * 4 * thw
    nb = max(1, min(N, nb_cap, per_block_budget // max(per_image_bytes, 1)))
    n_steps = pl.cdiv(N, nb)

    if n_steps * hw_steps < 2:
        if N >= 2:
            nb = (N + 1) // 2                        # split batch across >=2 steps
        elif HW >= 256:
            thw = max(128, ((HW // 2 + 127) // 128) * 128)  # split HW across >=2 steps
    return nb, thw


def conv1x1_plus(x_nchw, weight, bias, other=1.0):
    """x_nchw: (N, Cin, H, W); weight: (Cout, Cin); bias: (Cout,). Returns NCHW."""
    N, Cin, H, W = x_nchw.shape
    Cout = weight.shape[0]
    HW = H * W

    # Free reshapes (no data movement).
    x3 = x_nchw.reshape(N, Cin, HW)
    # Fold the `+ other` into the bias once on the host side.
    b = (bias.astype(jnp.float32) + jnp.float32(other)).reshape(Cout, 1)

    nb, thw = _choose_tiling(N, Cin, Cout, HW)
    grid = (pl.cdiv(N, nb), pl.cdiv(HW, thw))

    # Explicit scoped-VMEM budget: double-buffered in+out blocks + params + headroom.
    in_block_bytes = nb * Cin * thw * 4
    out_block_bytes = nb * Cout * thw * 4
    vmem_limit = int(2 * (in_block_bytes + out_block_bytes)
                     + Cout * Cin * 4 + Cout * 4 + (2 << 20))
    vmem_limit = max(vmem_limit, 4 << 20)

    flops = 2 * N * Cout * Cin * HW
    bytes_accessed = (N * Cin * HW + N * Cout * HW) * 4 + Cout * Cin * 4 + Cout * 4

    out3 = pl.pallas_call(
        _conv1x1_kernel,
        out_shape=jax.ShapeDtypeStruct((N, Cout, HW), x_nchw.dtype),
        grid_spec=pltpu.PrefetchScalarGridSpec(
            num_scalar_prefetch=0,
            grid=grid,
            in_specs=[
                pl.BlockSpec((nb, Cin, thw), lambda n, s: (n, 0, s)),
                pl.BlockSpec((Cout, Cin), lambda n, s: (0, 0)),
                pl.BlockSpec((Cout, 1), lambda n, s: (0, 0)),
            ],
            out_specs=pl.BlockSpec((nb, Cout, thw), lambda n, s: (n, 0, s)),
        ),
        compiler_params=pltpu.CompilerParams(
            dimension_semantics=("parallel", "parallel"),
            vmem_limit_bytes=vmem_limit),
        cost_estimate=pl.CostEstimate(flops=flops, transcendentals=0,
                                      bytes_accessed=bytes_accessed),
    )(x3, weight, b)

    # Free reshape back to NCHW.
    return out3.reshape(N, Cout, H, W)


if __name__ == "__main__":
    key = jax.random.PRNGKey(0)
    kx, kw, kb = jax.random.split(key, 3)

    # Small shapes consistent with the module: Cin=32, Cout=64 fixed by Conv2d(32, 64, 1).
    N, Cin, H, W, Cout = 2, 32, 16, 16, 64
    x = jax.random.normal(kx, (N, Cin, H, W), dtype=jnp.float32)

    # Deterministic parameter init (mimics Conv2d's uniform(-1/sqrt(fan_in), +...)).
    fan_in = Cin * 1 * 1
    bound = 1.0 / jnp.sqrt(fan_in)
    weight = jax.random.uniform(kw, (Cout, Cin), minval=-bound, maxval=bound,
                                dtype=jnp.float32)
    bias = jax.random.uniform(kb, (Cout,), minval=-bound, maxval=bound,
                              dtype=jnp.float32)

    out = conv1x1_plus(x, weight, bias, other=1.0)
    out = jax.block_until_ready(out)

    # Reference check in plain JAX (1x1 conv == einsum over channels).
    ref = jnp.einsum("nchw,oc->nohw", x, weight) + bias[None, :, None, None] + 1.0
    assert out.shape == (N, Cout, H, W)
    assert jnp.allclose(out, ref, atol=1e-4, rtol=1e-4)

    print("KERNEL_OK")
</pallas_src>

<mosaic_0001>
module attributes {stable_mosaic.version = 11 : i64} {
  func.func @_conv1x1_kernel(%arg0: i32, %arg1: i32, %arg2: memref<1x32x256xf32, #tpu.memory_space<vmem>>, %arg3: memref<64x32xf32, #tpu.memory_space<vmem>>, %arg4: memref<64x1xf32, #tpu.memory_space<vmem>>, %arg5: memref<1x64x256xf32, #tpu.memory_space<vmem>>) attributes {dimension_semantics = [#tpu.dimension_semantics<parallel>, #tpu.dimension_semantics<parallel>], iteration_bounds = array<i64: 2, 1>, scalar_prefetch = 0 : i64, scratch_operands = 0 : i64, tpu.core_type = #tpu.core_type<tc>, window_params = [{transform_indices = @transform_0, window_bounds = array<i64: 1, 32, 256>}, {pipeline_mode = #tpu.pipeline_mode<synchronous>, transform_indices = @transform_1, window_bounds = array<i64: 64, 32>}, {pipeline_mode = #tpu.pipeline_mode<synchronous>, transform_indices = @transform_2, window_bounds = array<i64: 64, 1>}, {transform_indices = @transform_3, window_bounds = array<i64: 1, 64, 256>}]} {
    %c0 = arith.constant 0 : index
    %c0_0 = arith.constant 0 : index
    %0 = vector.load %arg3[%c0, %c0_0] : memref<64x32xf32, #tpu.memory_space<vmem>>, vector<64x32xf32>
    %c0_1 = arith.constant 0 : index
    %c0_2 = arith.constant 0 : index
    %1 = vector.load %arg4[%c0_1, %c0_2] : memref<64x1xf32, #tpu.memory_space<vmem>>, vector<64x1xf32>
    %c0_3 = arith.constant 0 : index
    %c0_4 = arith.constant 0 : index
    %c0_5 = arith.constant 0 : index
    %2 = vector.load %arg2[%c0_3, %c0_4, %c0_5] : memref<1x32x256xf32, #tpu.memory_space<vmem>>, vector<1x32x256xf32>
    %3 = vector.shape_cast %2 : vector<1x32x256xf32> to vector<32x256xf32>
    %cst = arith.constant dense<0.000000e+00> : vector<64x256xf32>
    %4 = tpu.matmul %0, %3, %cst {dimension_numbers = #tpu.dot_dimension_numbers<[1], [0], [0], [1], [0, 0, 1, 1], [], []>} : vector<64x32xf32>, vector<32x256xf32>, vector<64x256xf32> -> vector<64x256xf32>
    %5 = vector.broadcast %1 : vector<64x1xf32> to vector<64x256xf32>
    %6 = arith.addf %4, %5 : vector<64x256xf32>
    %c0_6 = arith.constant 0 : index
    %c0_7 = arith.constant 0 : index
    %c0_8 = arith.constant 0 : index
    %7 = vector.load %arg5[%c0_6, %c0_7, %c0_8] : memref<1x64x256xf32, #tpu.memory_space<vmem>>, vector<1x64x256xf32>
    %8 = vector.shape_cast %7 : vector<1x64x256xf32> to vector<64x256xf32>
    %9 = vector.shape_cast %6 : vector<64x256xf32> to vector<1x64x256xf32>
    tpu.vector_store %arg5[%c0_6, %c0_7, %c0_8], %9 {strides = array<i32>} : memref<1x64x256xf32, #tpu.memory_space<vmem>>, vector<1x64x256xf32>,
    return
  }
  func.func @transform_0(%arg0: i32, %arg1: i32) -> (i32, i32, i32) {
    %c0_i32 = arith.constant 0 : i32
    %c0_i32_0 = arith.constant 0 : i32
    return %arg0, %c0_i32, %arg1 : i32, i32, i32
  }
  func.func @transform_1(%arg0: i32, %arg1: i32) -> (i32, i32) {
    %c0_i32 = arith.constant 0 : i32
    %c0_i32_0 = arith.constant 0 : i32
    %c0_i32_1 = arith.constant 0 : i32
    return %c0_i32, %c0_i32_0 : i32, i32
  }
  func.func @transform_2(%arg0: i32, %arg1: i32) -> (i32, i32) {
    %c0_i32 = arith.constant 0 : i32
    %c0_i32_0 = arith.constant 0 : i32
    %c0_i32_1 = arith.constant 0 : i32
    return %c0_i32, %c0_i32_0 : i32, i32
  }
  func.func @transform_3(%arg0: i32, %arg1: i32) -> (i32, i32, i32) {
    %c0_i32 = arith.constant 0 : i32
    %c0_i32_0 = arith.constant 0 : i32
    return %arg0, %c0_i32, %arg1 : i32, i32, i32
  }
}

</mosaic_0001>

<bundles_post_ra>
// kernel: tpu_custom_call.1
= control target key start
LH: loop header
LB: loop body
LE: loop exit
PB: predicated region body
PF: predicated region fallthrough
CT: control target
= control target key end

     0   :  { %8 = vsyncpa [#allocation3], 0  ;;  %s871_s0 = inlined_call_operand.vmem [shape: f32[2,32,256], index: 0, kind: input, shape index: {}]   ;;  %s872_s1 = inlined_call_operand.vmem [shape: f32[64,32], index: 1, kind: input, shape index: {}]   ;;  %s873_s2 = inlined_call_operand.vmem [shape: f32[64,1], index: 2, kind: input, shape index: {}]   ;;  %s874_s3 = inlined_call_operand.hbm [shape: f32[2,64,256], index: 3, kind: output, shape index: {}]  }
   0x1   :  { %10 = vsyncpa [#allocation3 + $0x1], 0  ;;  %s687_s12 = smov 0   ;;  %s689_s13 = smov 0  }
   0x2   :  { %s691_s14 = smov 0   ;;  %s693_s15 = smov 0  }
   0x3   :  { %s695_s16 = smov 0   ;;  %s697_s17 = smov 0  }
   0x4 LB: > { %s484_s18 = sadd.s32 4294967295, %s662_s17   ;;  %s485_s19 = sadd.s32 4294967294, %s662_s17   ;;  %s662_s17 = sphi %s697_s17, %s16_s17   ;;  %s658_s16 = sphi %s695_s16, %s881_s16   ;;  %s654_s15 = sphi %s693_s15, %s880_s15   ;;  %s650_s14 = sphi %s691_s14, %s879_s14   ;;  %s646_s13 = sphi %s689_s13, %s878_s13   ;;  %s642_s12 = sphi %s687_s12, %s877_s12  }
   0x5   : > { %s28_s20 = sadd.s32 1, %s658_s16  ;;  %s107_s21 = sadd.s32 1, %s650_s14 }
   0x6   : > { %p30_p0 = scmp.ge.s32.totalorder %s28_s20, 2  ;;  %p117_p1 = scmp.ne.s32.totalorder %s650_s14, %s646_s13 }
   0x7   : > { %p118_p2 = scmp.eq.s32.totalorder %s484_s18, 1  ;;  %p123_p3 = scmp.ne.s32.totalorder %s646_s13, %s642_s12 }
   0x8   : > { %s883_s20 = smov (%p30_p0, %s28_s20), 0  ;;  %p124_p5 = scmp.eq.s32.totalorder %s485_s19, 1 }
   0x9   : > { %p727_p4 = por %p118_p2, %p117_p1  ;;  %s102_s23 = ssub.s32 %s658_s16, %s883_s20 }
   0xa   : > { %p488_p6 = scmp.ge.s32.totalorder %s662_s17, 1  ;;  %p105_p7 = scmp.eq.s32.totalorder %s102_s23, 0 }
   0xb   : > { %p734_p8 = por %p124_p5, %p123_p3  ;;  %p161_p9 = scmp.lt.s32.totalorder %s662_s17, 3 }
   0xc   : > { %s740_s25 = scalar_select %p105_p7, %s650_s14, %s107_s21  }
   0xd   : > { %p162_p10 = pnand %p488_p6, %p161_p9 }
   0xe   : > { %p190_p11 = scmp.lt.s32.totalorder (!%p162_p10), %s654_s15, 1  ;;  %s186_s29 = sand.u32 (!%p162_p10), 1, %s646_s13  }
   0xf   : > { %165 = sbr.rel (%p162_p10) target bundleno = 196 (0xc4), region = 32  ;;  %s514_s5 = sshll.u32 (!%p162_p10), %s654_s15, 7 }
  0x10   : > { %s401_s8 = scalar_lea.hbm (!%p162_p10), %s874_s3, %s514_s5  ;;  %s388_s10 = scalar_lea.sflag (!%p162_p10), [#allocation3], %s186_s29 }
  0x11   : > { %s604_s23 = scalar_lea.hbm (!%p162_p10), %s874_s3, 256 }
  0x14   : > { %v664_v0 = vmov 0   ;;  %v210_v1 = vld [vmem:[%s873_s2 + $0x10] sm:$0xff]  ;;  %v208_v2 = vld [vmem:[%s873_s2] sm:$0xff]  ;;  %s191_s30 = scalar_select %p190_p11, %s654_s15, 1  ;;  %vm264_vm0 = vcmask 261120   ;;  %v211_v13 = vld [vmem:[%s873_s2 + $0x18] sm:$0xff] }
  0x15   : > { %582 = vset.pattern.permute.xlu1 %v664_v0  ;;  %581 = vset.pattern.permute.xlu0 %v664_v0  ;;  %v200_v11 = vld [vmem:[%s872_s1] sm:$0xff]  ;;  %v209_v14 = vld [vmem:[%s873_s2 + $0x8] sm:$0xff]  ;;  %v215_v18 = vld [vmem:[%s873_s2 + $0x38] sm:$0xff]  ;;  %s404_s15 = sshll.u32 %s401_s8, 4  ;;  %s405_s15 = int_to_ptr.hbm [resolvable:$true] %s404_s15 }
  0x16   : > { %236 = vperm.xlu1 %582, %v210_v1   ;;  %226 = vperm.xlu0 %581, %v208_v2   ;;  %s513_s4 = sshll.u32 %s191_s30, 6  ;;  %v204_v12 = vld [vmem:[%s872_s1 + $0x20] sm:$0xff]  ;;  %v201_v16 = vld [vmem:[%s872_s1 + $0x8] sm:$0xff]  ;;  %v214_v19 = vld [vmem:[%s873_s2 + $0x30] sm:$0xff]  ;;  %s489_s30 = sshll.u32 %s186_s29, 7 }
  0x17   : > { %583 = vset.pattern.permute.xlu2 %v664_v0  ;;  %s197_s7 = scalar_lea.vmem %s871_s0, %s513_s4  ;;  %v212_v15 = vld [vmem:[%s873_s2 + $0x20] sm:$0xff]  ;;  %v205_v17 = vld [vmem:[%s872_s1 + $0x28] sm:$0xff]  ;;  %v202_v21 = vld [vmem:[%s872_s1 + $0x10] sm:$0xff]  ;;  %s814_s4 = scalar_lea.vmem [#allocation2], %s489_s30 }
  0x18   : > { %v222_v3 = vld [vmem:[%s197_s7 + $0x30] sm:$0xff]  ;;  %v223_v4 = vld [vmem:[%s197_s7 + $0x38] sm:$0xff]  ;;  %v220_v5 = vld [vmem:[%s197_s7 + $0x20] sm:$0xff]  ;;  %246 = vperm.xlu2 %583, %v212_v15   ;;  %s402_s9 = sshll.u32 %s814_s4, 4  ;;  %s598_s11 = sshra.s32 %s405_s15, 4  ;;  %s403_s9 = int_to_ptr.vmem [resolvable:$true] %s402_s9  ;;  %s599_s11 = int_to_ptr.hbm [resolvable:$true] %s598_s11 }
  0x19   : > { %301 = vmatpush.msra.mxu0 %v222_v3  ;;  %515 = vmatpush.msra.mxu2 %v222_v3  ;;  %v221_v6 = vld [vmem:[%s197_s7 + $0x28] sm:$0xff]  ;;  %v218_v7 = vld [vmem:[%s197_s7 + $0x10] sm:$0xff]  ;;  %v219_v8 = vld [vmem:[%s197_s7 + $0x18] sm:$0xff]  ;;  %s600_s18 = scalar_lea.hbm %s599_s11, 128  ;;  %p605_p1 = scmp.lt.s32.totalorder %s599_s11, %s874_s3 }
  0x1a   : > { %342 = vmatpush.msra.mxu1 %v223_v4  ;;  %519 = vmatpush.msra.mxu3 %v223_v4  ;;  %v216_v9 = vld [vmem:[%s197_s7] sm:$0xff]  ;;  %v217_v10 = vld [vmem:[%s197_s7 + $0x8] sm:$0xff]  ;;  %v206_v22 = vld [vmem:[%s872_s1 + $0x30] sm:$0xff]  ;;  %p601_p12 = scmp.ne.s32.totalorder %s599_s11, %s600_s18  ;;  %p606_p2 = scmp.lt.s32.totalorder %s604_s23, %s600_s18 }
  0x1b   : > { %302 = vmatpush.msra.mxu0 %v220_v5  ;;  %516 = vmatpush.msra.mxu2 %v220_v5  ;;  %v213_v20 = vld [vmem:[%s873_s2 + $0x28] sm:$0xff]  ;;  %v203_v23 = vld [vmem:[%s872_s1 + $0x18] sm:$0xff] }
  0x1c   : > { %343 = vmatpush.msra.mxu1 %v221_v6  ;;  %520 = vmatpush.msra.mxu3 %v221_v6  ;;  %v207_v24 = vld [vmem:[%s872_s1 + $0x38] sm:$0xff]  ;;  %p602_p13 = pnand %p601_p12, %p727_p4  ;;  %p607_p3 = por %p606_p2, %p605_p1 }
  0x1d   : > { %303 = vmatpush.msra.mxu0 %v218_v7  ;;  %517 = vmatpush.msra.mxu2 %v218_v7 }
  0x1e   : > { %344 = vmatpush.msra.mxu1 %v219_v8  ;;  %521 = vmatpush.msra.mxu3 %v219_v8  ;;  %p603_p0 = pneg %p602_p13 }
  0x1f   : > { %304 = vmatpush.msra.mxu0 %v216_v9  ;;  %518 = vmatpush.msra.mxu2 %v216_v9 }
  0x20   : > { %345 = vmatpush.msra.mxu1 %v217_v10  ;;  %522 = vmatpush.msra.mxu3 %v217_v10  ;;  %p608_p5 = pnand %p607_p3, %p603_p0 }
  0x21   : > { %492 = vmatmul.msk.f32.vlgmr.msra.gmra.mxu0 %vm264_vm0, %v200_v11  ;;  %496 = vmatmul.msk.f32.vlgmr.msra.gmra.mxu2 %vm264_vm0, %v204_v12 }
  0x22   : > { %500 = vmatmul.msk.f32.vlgmr.msra.gmra.mxu1 %vm264_vm0, %v200_v11  ;;  %504 = vmatmul.msk.f32.vlgmr.msra.gmra.mxu3 %vm264_vm0, %v204_v12 }
  0x23   : > { %241 = vperm.xlu1 %582, %v211_v13   ;;  %231 = vperm.xlu0 %581, %v209_v14  }
  0x24   : > { %251 = vperm.xlu2 %583, %v213_v20  }
  0x29   : > { %493 = vmatmul.msk.f32.gmra.mxu0 %vm264_vm0, %v201_v16  ;;  %497 = vmatmul.msk.f32.gmra.mxu2 %vm264_vm0, %v205_v17 }
  0x2a   : > { %501 = vmatmul.msk.f32.gmra.mxu1 %vm264_vm0, %v201_v16  ;;  %505 = vmatmul.msk.f32.gmra.mxu3 %vm264_vm0, %v205_v17 }
  0x2b   : > { %261 = vperm.xlu1 %582, %v215_v18   ;;  %256 = vperm.xlu0 %581, %v214_v19  }
  0x31   : > { %494 = vmatmul.msk.f32.gmra.mxu0 %vm264_vm0, %v202_v21  ;;  %498 = vmatmul.msk.f32.gmra.mxu2 %vm264_vm0, %v206_v22 }
  0x32   : > { %502 = vmatmul.msk.f32.gmra.mxu1 %vm264_vm0, %v202_v21  ;;  %506 = vmatmul.msk.f32.gmra.mxu3 %vm264_vm0, %v206_v22 }
  0x39   : > { %495 = vmatmul.msk.f32.gmra.mxu0 %vm264_vm0, %v203_v23  ;;  %499 = vmatmul.msk.f32.gmra.mxu2 %vm264_vm0, %v207_v24 }
  0x3a   : > { %503 = vmatmul.msk.f32.gmra.mxu1 %vm264_vm0, %v203_v23  ;;  %507 = vmatmul.msk.f32.gmra.mxu3 %vm264_vm0, %v207_v24 }
  0x72   : > { %v247_v30 = vpop.permute.xlu2 %246 }
  0x7e   : > { %v252_v41 = vpop.permute.xlu2 %251 }
  0x88   : > { %v227_v25 = vpop.permute.xlu0 %226  ;;  %v237_v39 = vpop.permute.xlu1 %236 }
  0x95   : > { %v232_v34 = vpop.permute.xlu0 %231  ;;  %v242_v50 = vpop.permute.xlu1 %241 }
  0x9d   : > { %v257_v51 = vpop.permute.xlu0 %256  ;;  %v262_v60 = vpop.permute.xlu1 %261 }
  0x9e   : > { %v306_v26 = vpop.f32.mrf.mxu0 }
  0x9f   : > { %v307_v27 = vadd.f32 %v306_v26, %v227_v25  ;;  %v347_v28 = vpop.f32.mrf.mxu1 }
  0xa0   : > { %v348_v29 = vadd.f32 %v347_v28, %v227_v25 }
  0xa1   : > { %371 = vst [vmem:[%s814_s4] sm:$0xff] %v307_v27 }
  0xa2   : > { %372 = vst [vmem:[%s814_s4 + $0x8] sm:$0xff] %v348_v29 }
  0xa4   : > { %v318_v31 = vpop.f32.mrf.mxu2 }
  0xa5   : > { %v319_v32 = vadd.f32 %v318_v31, %v247_v30  ;;  %v359_v33 = vpop.f32.mrf.mxu3 }
  0xa6   : > { %v360_v35 = vadd.f32 %v359_v33, %v247_v30  ;;  %v309_v36 = vpop.f32.mrf.mxu0 }
  0xa7   : > { %379 = vst [vmem:[%s814_s4 + $0x40] sm:$0xff] %v319_v32  ;;  %v310_v37 = vadd.f32 %v309_v36, %v232_v34  ;;  %v350_v38 = vpop.f32.mrf.mxu1 }
  0xa8   : > { %380 = vst [vmem:[%s814_s4 + $0x48] sm:$0xff] %v360_v35  ;;  %v351_v40 = vadd.f32 %v350_v38, %v232_v34 }
  0xa9   : > { %373 = vst [vmem:[%s814_s4 + $0x10] sm:$0xff] %v310_v37 }
  0xaa   : > { %374 = vst [vmem:[%s814_s4 + $0x18] sm:$0xff] %v351_v40 }
  0xac   : > { %v321_v42 = vpop.f32.mrf.mxu2 }
  0xad   : > { %v322_v43 = vadd.f32 %v321_v42, %v252_v41  ;;  %v362_v44 = vpop.f32.mrf.mxu3 }
  0xae   : > { %v363_v45 = vadd.f32 %v362_v44, %v252_v41  ;;  %v312_v46 = vpop.f32.mrf.mxu0 }
  0xaf   : > { %381 = vst [vmem:[%s814_s4 + $0x50] sm:$0xff] %v322_v43  ;;  %v313_v47 = vadd.f32 %v312_v46, %v237_v39  ;;  %v353_v48 = vpop.f32.mrf.mxu1 }
  0xb0   : > { %382 = vst [vmem:[%s814_s4 + $0x58] sm:$0xff] %v363_v45  ;;  %v354_v49 = vadd.f32 %v353_v48, %v237_v39 }
  0xb1   : > { %375 = vst [vmem:[%s814_s4 + $0x20] sm:$0xff] %v313_v47 }
  0xb2   : > { %376 = vst [vmem:[%s814_s4 + $0x28] sm:$0xff] %v354_v49 }
  0xb4   : > { %v324_v52 = vpop.f32.mrf.mxu2 }
  0xb5   : > { %v325_v53 = vadd.f32 %v324_v52, %v257_v51  ;;  %v365_v54 = vpop.f32.mrf.mxu3 }
  0xb6   : > { %v366_v55 = vadd.f32 %v365_v54, %v257_v51  ;;  %v315_v56 = vpop.f32.mrf.mxu0 }
  0xb7   : > { %383 = vst [vmem:[%s814_s4 + $0x60] sm:$0xff] %v325_v53  ;;  %v316_v57 = vadd.f32 %v315_v56, %v242_v50  ;;  %v356_v58 = vpop.f32.mrf.mxu1 }
  0xb8   : > { %384 = vst [vmem:[%s814_s4 + $0x68] sm:$0xff] %v366_v55  ;;  %v357_v59 = vadd.f32 %v356_v58, %v242_v50 }
  0xb9   : > { %377 = vst [vmem:[%s814_s4 + $0x30] sm:$0xff] %v316_v57 }
  0xba   : > { %378 = vst [vmem:[%s814_s4 + $0x38] sm:$0xff] %v357_v59 }
  0xbc   : > { %v327_v61 = vpop.f32.mrf.mxu2 }
  0xbd   : > { %v328_v62 = vadd.f32 %v327_v61, %v262_v60  ;;  %v368_v63 = vpop.f32.mrf.mxu3 }
  0xbe   : > { %v369_v0 = vadd.f32 %v368_v63, %v262_v60 }
  0xbf   : > { %385 = vst [vmem:[%s814_s4 + $0x70] sm:$0xff] %v328_v62 }
  0xc0   : > { %386 = vst [vmem:[%s814_s4 + $0x78] sm:$0xff] %v369_v0 }
  0xc1   : > { %611 = shalt.err (!%p608_p5)
}
  0xc2   : > { %s665_s28 = smov 256   ;;  %s666_s29 = smov 16  }
  0xc3   : > { %523 = dma.vmem_to_hbm [thread:$0]  (%p727_p4), %s403_s9, 2048, %s405_s15, %s388_s10, %s665_s28, %s665_s28, %s666_s29  }
  0xc4 PF: > { %p529_p6 = scmp.ge.s32.totalorder %s662_s17, 2  ;;  %s419_s30 = sand.u32 1, %s642_s12  }
  0xc5   : > { %s420_s4 = scalar_lea.sflag [#allocation3], %s419_s30 }
  0xc6   : > { %p526_p7 = pnand %p529_p6, %p734_p8 }
  0xc8   : > { %p527_p9 = pneg %p526_p7 }
  0xca   : > { %637 = dma.done.wait (%p527_p9), %s420_s4, 2048  }
  0xcb   : > { %639 = vsyncadd (%p527_p9), %s420_s4, 4294965248  ;;  %s16_s17 = sadd.s32 1, %s662_s17   ;;  %s877_s12 = smov %s646_s13 }
  0xcc   : > { %p13_p10 = scmp.ge.s32.totalorder %s16_s17, 4   ;;  %s878_s13 = smov %s650_s14 }
  0xcd   : > { %s879_s14 = smov %s740_s25  ;;  %s880_s15 = smov %s658_s16 }
  0xce   : > { %s881_s16 = smov %s883_s20  ;;  %15 = sbr.rel (!%p13_p10) target bundleno = 4 (0x4), region = 67 }
  0xd3   :  { %426 = vsyncpa [#allocation3], 1 }
  0xd4   :  { %428 = vsyncpa [#allocation3 + $0x1], 1 }

</bundles_post_ra>
